<compile_context>
chip_gen: v6e
topology: v6e:2x2x1
jax: 0.10.0
libtpu: 0.0.40
codegen_flags: <defaults>
</compile_context>

<pallas_src>
import functools

import jax
import jax.numpy as jnp
from jax.experimental import pallas as pl
from jax.experimental.pallas import tpu as pltpu


def _cdiv(a, b):
    return (a + b - 1) // b


def _pad_logit(dtype):
    # Huge-negative but finite in the table dtype: exp(pad - max) underflows to
    # exactly 0 in the f32 loss math, so padded classes vanish from the softmax.
    return max(float(jnp.finfo(dtype).min), -1e30)


def _vmem_budget_bytes():
    """~70% of physical VMEM; conservative v7x (64 MiB) default if query fails."""
    try:
        cap = int(pltpu.get_tpu_info().vmem_capacity_bytes)
    except Exception:
        cap = 64 * 1024 * 1024
    return int(cap * 0.7)


def _choose_tile_n(n, vr, vp, table_item, out_item, want, budget):
    """Largest multiple-of-8 tile_n <= want whose estimated footprint fits."""
    def footprint(t):
        table_b = 2 * vr * vp * table_item           # resident table (x2: default double-buffer)
        logits_b = 2 * t * vp * out_item             # pipelined logits output blocks
        tmp_b = 6 * t * vp * 4                       # f32 temporaries / gather scratch / slack
        onehot_b = t * vr * (table_item + 4)         # one-hot + iota (small-V path)
        small_b = 6 * t * 4                          # idx / target / per-row-loss blocks
        return table_b + logits_b + tmp_b + onehot_b + small_b

    tile = min(want, 8 * _cdiv(n, 8))
    tile = max(8, (tile // 8) * 8)
    while tile > 8 and footprint(tile) > budget:
        tile = max(8, ((tile // 2) // 8) * 8)
    return tile, footprint(tile)


def _ce_rows(logits, tgt, base_row, n_real):
    """Per-row cross entropy (f32). Rows >= n_real (tail padding) masked to 0."""
    m = jnp.max(logits, axis=-1, keepdims=True)
    lse = m + jnp.log(jnp.sum(jnp.exp(logits - m), axis=-1, keepdims=True))
    cls = jax.lax.broadcasted_iota(jnp.int32, logits.shape, 1)
    picked = jnp.sum(jnp.where(cls == tgt, logits, 0.0), axis=-1, keepdims=True)
    rows = base_row + jax.lax.broadcasted_iota(jnp.int32, (logits.shape[0], 1), 0)
    return jnp.where(rows < n_real, lse - picked, 0.0)


# ----------------------------- small-V (one-hot / MXU) kernels ----------------

def _bigram_train_onehot_kernel(idx_ref, tgt_ref, table_ref, logits_ref, loss_ref,
                                *, n_real):
    tile_n = logits_ref.shape[0]
    vr = table_ref.shape[0]
    base = pl.program_id(0) * tile_n

    onehot = (jax.lax.broadcasted_iota(jnp.int32, (tile_n, vr), 1)
              == idx_ref[...]).astype(table_ref.dtype)
    logits = jnp.dot(onehot, table_ref[...], preferred_element_type=jnp.float32)
    logits_ref[...] = logits.astype(logits_ref.dtype)      # single dense lane-full store
    loss_ref[...] = _ce_rows(logits, tgt_ref[...], base, n_real)


def _bigram_infer_onehot_kernel(idx_ref, table_ref, logits_ref):
    tile_n = logits_ref.shape[0]
    vr = table_ref.shape[0]
    onehot = (jax.lax.broadcasted_iota(jnp.int32, (tile_n, vr), 1)
              == idx_ref[...]).astype(table_ref.dtype)
    logits_ref[...] = jnp.dot(onehot, table_ref[...],
                              preferred_element_type=jnp.float32).astype(logits_ref.dtype)


# --------------------------- large-V (row gather) fallback kernels ------------

def _bigram_train_gather_kernel(idx_sref, tgt_ref, table_ref, logits_ref, loss_ref,
                                scratch_ref, *, n_real):
    tile_n = logits_ref.shape[0]
    base = pl.program_id(0) * tile_n

    def gather_row(r, carry):
        scratch_ref[pl.ds(r, 1), :] = (
            table_ref[pl.ds(idx_sref[base + r], 1), :].astype(jnp.float32))
        return carry

    jax.lax.fori_loop(0, tile_n, gather_row, 0, unroll=8)

    logits = scratch_ref[...]                               # (tile_n, Vp) f32
    logits_ref[...] = logits.astype(logits_ref.dtype)       # single dense store
    loss_ref[...] = _ce_rows(logits, tgt_ref[...], base, n_real)


def _bigram_infer_gather_kernel(idx_sref, table_ref, logits_ref):
    tile_n = logits_ref.shape[0]
    base = pl.program_id(0) * tile_n

    def gather_row(r, carry):
        logits_ref[pl.ds(r, 1), :] = table_ref[pl.ds(idx_sref[base + r], 1), :]
        return carry

    jax.lax.fori_loop(0, tile_n, gather_row, 0, unroll=8)


# ------------------------------------ wrapper ---------------------------------

def bigram_forward(idxs, table, targets=None, *, tile_n_request=512,
                   max_onehot_rows=512):
    """Pallas port of BigramLanguageModel.forward.

    idxs:    (B, T) int32
    table:   (V, V) float (nn.Embedding weight)
    targets: optional (B, T) int32

    Returns (logits, loss):
      - targets is None  -> logits (B, T, V), loss = None
      - targets provided -> logits (B*T, V),  loss = scalar float32
    """
    B, T = idxs.shape
    V = table.shape[0]
    N = B * T
    Vp = 128 * _cdiv(V, 128)          # lane-dense class dim
    Vr = 8 * _cdiv(V, 8)              # sublane-aligned row dim
    out_dtype = table.dtype
    neg_pad = _pad_logit(out_dtype)

    t_item = jnp.dtype(table.dtype).itemsize
    budget = _vmem_budget_bytes()
    tile_n, fp = _choose_tile_n(N, Vr, Vp, t_item, t_item, tile_n_request, budget)
    N_pad = tile_n * _cdiv(N, tile_n)
    num_tiles = N_pad // tile_n

    use_onehot = Vr <= max_onehot_rows
    # TODO(synk): for very large V the table should stay in HBM (memory_space=pl.ANY)
    # with a manual DMA-gather prefetch ring instead of being VMEM-resident.

    vmem_limit = int(min(max(fp + (8 << 20), 32 << 20), max(budget, 32 << 20)))
    cp = pltpu.CompilerParams(dimension_semantics=("parallel",),
                              vmem_limit_bytes=vmem_limit)

    # Pad table: class (lane) dim with a huge-negative logit, row dim with zeros.
    table_p = table
    if Vp != V:
        table_p = jnp.pad(table_p, ((0, 0), (0, Vp - V)), constant_values=neg_pad)
    if Vr != V:
        table_p = jnp.pad(table_p, ((0, Vr - V), (0, 0)))

    idx_flat = idxs.reshape(N).astype(jnp.int32)
    if N_pad != N:
        idx_flat = jnp.pad(idx_flat, (0, N_pad - N))
    idx_col = idx_flat.reshape(N_pad, 1)

    logits_spec_plain = pl.BlockSpec((tile_n, Vp), lambda i: (i, 0))
    table_spec_plain = pl.BlockSpec((Vr, Vp), lambda i: (0, 0))
    col_spec_plain = pl.BlockSpec((tile_n, 1), lambda i: (i, 0))

    if targets is None:
        if use_onehot:
            logits_p = pl.pallas_call(
                _bigram_infer_onehot_kernel,
                out_shape=jax.ShapeDtypeStruct((N_pad, Vp), out_dtype),
                grid=(num_tiles,),
                in_specs=[col_spec_plain, table_spec_plain],
                out_specs=logits_spec_plain,
                compiler_params=cp,
            )(idx_col, table_p)
        else:
            logits_p = pl.pallas_call(
                _bigram_infer_gather_kernel,
                out_shape=jax.ShapeDtypeStruct((N_pad, Vp), out_dtype),
                grid_spec=pltpu.PrefetchScalarGridSpec(
                    num_scalar_prefetch=1,
                    grid=(num_tiles,),
                    in_specs=[pl.BlockSpec((Vr, Vp), lambda i, idx: (0, 0))],
                    out_specs=pl.BlockSpec((tile_n, Vp), lambda i, idx: (i, 0))),
                compiler_params=cp,
            )(idx_flat, table_p)
        logits = logits_p[:N, :V] if (N_pad != N or Vp != V) else logits_p
        return logits.reshape(B, T, V), None

    tgt_col = targets.reshape(N, 1).astype(jnp.int32)
    if N_pad != N:
        tgt_col = jnp.pad(tgt_col, ((0, N_pad - N), (0, 0)))

    out_shape = (jax.ShapeDtypeStruct((N_pad, Vp), out_dtype),
                 jax.ShapeDtypeStruct((N_pad, 1), jnp.float32))

    if use_onehot:
        logits_p, loss_rows = pl.pallas_call(
            functools.partial(_bigram_train_onehot_kernel, n_real=N),
            out_shape=out_shape,
            grid=(num_tiles,),
            in_specs=[col_spec_plain, col_spec_plain, table_spec_plain],
            out_specs=(logits_spec_plain, col_spec_plain),
            compiler_params=cp,
        )(idx_col, tgt_col, table_p)
    else:
        logits_p, loss_rows = pl.pallas_call(
            functools.partial(_bigram_train_gather_kernel, n_real=N),
            out_shape=out_shape,
            grid_spec=pltpu.PrefetchScalarGridSpec(
                num_scalar_prefetch=1,
                grid=(num_tiles,),
                in_specs=[pl.BlockSpec((tile_n, 1), lambda i, idx: (i, 0)),
                          pl.BlockSpec((Vr, Vp), lambda i, idx: (0, 0))],
                out_specs=(pl.BlockSpec((tile_n, Vp), lambda i, idx: (i, 0)),
                           pl.BlockSpec((tile_n, 1), lambda i, idx: (i, 0))),
                scratch_shapes=[pltpu.VMEM((tile_n, Vp), jnp.float32)]),
            compiler_params=cp,
        )(idx_flat, tgt_col, table_p)

    loss = jnp.sum(loss_rows) / N                 # padded tail rows are already 0
    logits = logits_p[:N, :V] if (N_pad != N or Vp != V) else logits_p
    return logits, loss


def _reference_forward(idxs, table, targets):
    """Pure-JAX reference for correctness checking."""
    logits = table[idxs]                          # (B, T, V)
    B, T, V = logits.shape
    lf = logits.reshape(B * T, V)
    tf = targets.reshape(B * T)
    lf32 = lf.astype(jnp.float32)
    logZ = jax.nn.logsumexp(lf32, axis=-1)
    picked = jnp.take_along_axis(lf32, tf[:, None], axis=-1)[:, 0]
    return lf, jnp.mean(logZ - picked)


if __name__ == "__main__":
    # Deterministic "dataset"-style vocab, like the original script.
    text = "hello bigram world! this is a tiny pallas test."
    vocab = sorted(list(set(text)))
    vocab_size = len(vocab)

    batch_size, context_len = 4, 8   # matches the module's constants

    key = jax.random.PRNGKey(0)
    k_table, k_idx, k_tgt = jax.random.split(key, 3)

    # nn.Embedding default init: N(0, 1)
    table = jax.random.normal(k_table, (vocab_size, vocab_size), dtype=jnp.float32)
    idxs = jax.random.randint(k_idx, (batch_size, context_len), 0, vocab_size,
                              dtype=jnp.int32)
    targets = jax.random.randint(k_tgt, (batch_size, context_len), 0, vocab_size,
                                 dtype=jnp.int32)

    ref_logits, ref_loss = _reference_forward(idxs, table, targets)

    # Training path (one-hot / MXU gather, fused cross-entropy).
    logits, loss = bigram_forward(idxs, table, targets)
    jax.block_until_ready((logits, loss))
    assert logits.shape == (batch_size * context_len, vocab_size)
    assert jnp.allclose(logits, ref_logits, atol=1e-5, rtol=1e-5)
    assert jnp.allclose(loss, ref_loss, atol=1e-5, rtol=1e-5)

    # Inference path (no targets): gather-only kernel, loss None.
    logits_nt, loss_nt = bigram_forward(idxs, table, None)
    jax.block_until_ready(logits_nt)
    assert loss_nt is None
    assert logits_nt.shape == (batch_size, context_len, vocab_size)
    assert jnp.allclose(logits_nt.reshape(-1, vocab_size), ref_logits,
                        atol=1e-5, rtol=1e-5)

    # Large-vocab fallback path (scalar-prefetched fori_loop row gather), forced.
    logits_g, loss_g = bigram_forward(idxs, table, targets, max_onehot_rows=0)
    logits_gnt, _ = bigram_forward(idxs, table, None, max_onehot_rows=0)
    jax.block_until_ready((logits_g, loss_g, logits_gnt))
    assert jnp.allclose(logits_g, ref_logits, atol=1e-5, rtol=1e-5)
    assert jnp.allclose(loss_g, ref_loss, atol=1e-5, rtol=1e-5)
    assert jnp.allclose(logits_gnt.reshape(-1, vocab_size), ref_logits,
                        atol=1e-5, rtol=1e-5)

    # TODO(synk): generate() (autoregressive torch.multinomial sampling loop) is
    # host-side control flow around forward() and is not implemented as a kernel.
    print("KERNEL_OK")
</pallas_src>

<mosaic_0001>
module attributes {stable_mosaic.version = 11 : i64} {
  func.func @_bigram_train_onehot_kernel(%arg0: i32, %arg1: memref<32x1xi32, #tpu.memory_space<vmem>>, %arg2: memref<32x1xi32, #tpu.memory_space<vmem>>, %arg3: memref<24x128xf32, #tpu.memory_space<vmem>>, %arg4: memref<32x128xf32, #tpu.memory_space<vmem>>, %arg5: memref<32x1xf32, #tpu.memory_space<vmem>>) attributes {dimension_semantics = [#tpu.dimension_semantics<parallel>], iteration_bounds = array<i64: 1>, scalar_prefetch = 0 : i64, scratch_operands = 0 : i64, tpu.core_type = #tpu.core_type<tc>, window_params = [{transform_indices = @transform_0, window_bounds = array<i64: 32, 1>}, {transform_indices = @transform_1, window_bounds = array<i64: 32, 1>}, {pipeline_mode = #tpu.pipeline_mode<synchronous>, transform_indices = @transform_2, window_bounds = array<i64: 24, 128>}, {transform_indices = @transform_3, window_bounds = array<i64: 32, 128>}, {transform_indices = @transform_4, window_bounds = array<i64: 32, 1>}]} {
    %c32_i32 = arith.constant 32 : i32
    %0 = arith.muli %arg0, %c32_i32 : i32
    %1 = tpu.iota {dimensions = array<i32: 1>} : vector<32x24xi32>
    %c0 = arith.constant 0 : index
    %c0_0 = arith.constant 0 : index
    %2 = vector.load %arg1[%c0, %c0_0] : memref<32x1xi32, #tpu.memory_space<vmem>>, vector<32x1xi32>
    %3 = vector.broadcast %2 : vector<32x1xi32> to vector<32x24xi32>
    %4 = arith.cmpi eq, %1, %3 : vector<32x24xi32>
    %5 = arith.extui %4 : vector<32x24xi1> to vector<32x24xi32>
    %6 = arith.sitofp %5 : vector<32x24xi32> to vector<32x24xf32>
    %c0_1 = arith.constant 0 : index
    %c0_2 = arith.constant 0 : index
    %7 = vector.load %arg3[%c0_1, %c0_2] : memref<24x128xf32, #tpu.memory_space<vmem>>, vector<24x128xf32>
    %cst = arith.constant dense<0.000000e+00> : vector<32x128xf32>
    %8 = tpu.matmul %6, %7, %cst {dimension_numbers = #tpu.dot_dimension_numbers<[1], [0], [0], [1], [0, 0, 1, 1], [], []>} : vector<32x24xf32>, vector<24x128xf32>, vector<32x128xf32> -> vector<32x128xf32>
    %c0_3 = arith.constant 0 : index
    %c0_4 = arith.constant 0 : index
    %9 = vector.load %arg4[%c0_3, %c0_4] : memref<32x128xf32, #tpu.memory_space<vmem>>, vector<32x128xf32>
    tpu.vector_store %arg4[%c0_3, %c0_4], %8 {strides = array<i32>} : memref<32x128xf32, #tpu.memory_space<vmem>>, vector<32x128xf32>,
    %c0_5 = arith.constant 0 : index
    %c0_6 = arith.constant 0 : index
    %10 = vector.load %arg2[%c0_5, %c0_6] : memref<32x1xi32, #tpu.memory_space<vmem>>, vector<32x1xi32>
    %cst_7 = arith.constant dense<0xFF800000> : vector<32xf32>
    %11 = vector.multi_reduction <maximumf>, %8, %cst_7 [1] : vector<32x128xf32> to vector<32xf32>
    %12 = vector.shape_cast %11 : vector<32xf32> to vector<32x1xf32>
    %13 = vector.broadcast %12 : vector<32x1xf32> to vector<32x128xf32>
    %14 = arith.subf %8, %13 : vector<32x128xf32>
    %15 = math.exp %14 : vector<32x128xf32>
    %cst_8 = arith.constant dense<0.000000e+00> : vector<32xf32>
    %16 = vector.multi_reduction <add>, %15, %cst_8 [1] : vector<32x128xf32> to vector<32xf32>
    %17 = vector.shape_cast %16 : vector<32xf32> to vector<32x1xf32>
    %18 = math.log %17 : vector<32x1xf32>
    %19 = arith.addf %12, %18 : vector<32x1xf32>
    %20 = tpu.iota {dimensions = array<i32: 1>} : vector<32x128xi32>
    %21 = vector.broadcast %10 : vector<32x1xi32> to vector<32x128xi32>
    %22 = arith.cmpi eq, %20, %21 : vector<32x128xi32>
    %cst_9 = arith.constant 0.000000e+00 : f32
    %23 = vector.broadcast %cst_9 : f32 to vector<32x128xf32>
    %24 = arith.select %22, %8, %23 : vector<32x128xi1>, vector<32x128xf32>
    %cst_10 = arith.constant dense<0.000000e+00> : vector<32xf32>
    %25 = vector.multi_reduction <add>, %24, %cst_10 [1] : vector<32x128xf32> to vector<32xf32>
    %26 = vector.shape_cast %25 : vector<32xf32> to vector<32x1xf32>
    %27 = tpu.iota {dimensions = array<i32: 0>} : vector<32x1xi32>
    %28 = vector.broadcast %0 : i32 to vector<32x1xi32>
    %29 = arith.addi %28, %27 : vector<32x1xi32>
    %c32_i32_11 = arith.constant 32 : i32
    %30 = vector.broadcast %c32_i32_11 : i32 to vector<32x1xi32>
    %31 = arith.cmpi slt, %29, %30 : vector<32x1xi32>
    %32 = arith.subf %19, %26 : vector<32x1xf32>
    %cst_12 = arith.constant 0.000000e+00 : f32
    %33 = vector.broadcast %cst_12 : f32 to vector<32x1xf32>
    %34 = arith.select %31, %32, %33 : vector<32x1xi1>, vector<32x1xf32>
    %c0_13 = arith.constant 0 : index
    %c0_14 = arith.constant 0 : index
    %35 = vector.load %arg5[%c0_13, %c0_14] : memref<32x1xf32, #tpu.memory_space<vmem>>, vector<32x1xf32>
    tpu.vector_store %arg5[%c0_13, %c0_14], %34 {strides = array<i32>} : memref<32x1xf32, #tpu.memory_space<vmem>>, vector<32x1xf32>,
    return
  }
  func.func @transform_0(%arg0: i32) -> (i32, i32) {
    %c0_i32 = arith.constant 0 : i32
    %c0_i32_0 = arith.constant 0 : i32
    return %arg0, %c0_i32 : i32, i32
  }
  func.func @transform_1(%arg0: i32) -> (i32, i32) {
    %c0_i32 = arith.constant 0 : i32
    %c0_i32_0 = arith.constant 0 : i32
    return %arg0, %c0_i32 : i32, i32
  }
  func.func @transform_2(%arg0: i32) -> (i32, i32) {
    %c0_i32 = arith.constant 0 : i32
    %c0_i32_0 = arith.constant 0 : i32
    %c0_i32_1 = arith.constant 0 : i32
    return %c0_i32, %c0_i32_0 : i32, i32
  }
  func.func @transform_3(%arg0: i32) -> (i32, i32) {
    %c0_i32 = arith.constant 0 : i32
    %c0_i32_0 = arith.constant 0 : i32
    return %arg0, %c0_i32 : i32, i32
  }
  func.func @transform_4(%arg0: i32) -> (i32, i32) {
    %c0_i32 = arith.constant 0 : i32
    %c0_i32_0 = arith.constant 0 : i32
    return %arg0, %c0_i32 : i32, i32
  }
}

</mosaic_0001>

<bundles_post_ra>
// kernel: tpu_custom_call.1
= control target key start
LH: loop header
LB: loop body
LE: loop exit
PB: predicated region body
PF: predicated region fallthrough
CT: control target
= control target key end

     0   :  { %v350_v2 = vmov 0   ;;  %s458_s0 = inlined_call_operand.vmem [shape: s32[32,1], index: 0, kind: input, shape index: {}]   ;;  %s459_s1 = inlined_call_operand.vmem [shape: s32[32,1], index: 1, kind: input, shape index: {}]   ;;  %s460_s2 = inlined_call_operand.vmem [shape: f32[24,128], index: 2, kind: input, shape index: {}]   ;;  %s461_s3 = inlined_call_operand.hbm [shape: f32[32,128], index: 3, kind: output, shape index: {0}]   ;;  %s462_s4 = inlined_call_operand.vmem [shape: f32[32,1], index: 4, kind: output, shape index: {1}]  }
   0x1   :  { %v21_v0 = vld [vmem:[%s458_s0 + $0x8] sm:$0xff]  ;;  %v20_v1 = vld [vmem:[%s458_s0] sm:$0xff]  ;;  %311 = vset.pattern.permute.xlu1 %v350_v2  ;;  %310 = vset.pattern.permute.xlu0 %v350_v2  ;;  %v50_v3 = vld [vmem:[%s460_s2 + $0x10] sm:$0xff] }
   0x2   :  { %28 = vperm.xlu1 %311, %v21_v0   ;;  %25 = vperm.xlu0 %310, %v20_v1   ;;  %v49_v4 = vld [vmem:[%s460_s2 + $0x8] sm:$0xff] }
   0x3   :  { %10 = vsyncpa [#allocation3], 0  ;;  %v23_v5 = vld [vmem:[%s458_s0 + $0x18] sm:$0xff]  ;;  %v22_v6 = vld [vmem:[%s458_s0 + $0x10] sm:$0xff]  ;;  %287 = vmatprep.subr.mxu0 %v50_v3  ;;  %299 = vmatprep.subr.mxu1 %v50_v3  ;;  %v18_v8 = vlaneseq  ;;  %vm51_vm0 = vcmask 195584   ;;  %v351_v12 = vmov 0.0  }
   0x4   :  { %288 = vmatpush3.msra.mxu0 %v50_v3  ;;  %302 = vmatpush3.msra.mxu1 %v50_v3  ;;  %v48_v7 = vld [vmem:[%s460_s2] sm:$0xff]  ;;  %v155_v24 = vld [vmem:[%s459_s1 + $0x10] sm:$0xff]  ;;  %v156_v25 = vld [vmem:[%s459_s1 + $0x18] sm:$0xff] }
   0x5   :  { %289 = vmatprep.subr.mxu0 %v49_v4  ;;  %300 = vmatprep.subr.mxu1 %v49_v4  ;;  %v401_v9 = vand.u32 127, %v18_v8  ;;  %v153_v23 = vld [vmem:[%s459_s1] sm:$0xff]  ;;  %v154_v26 = vld [vmem:[%s459_s1 + $0x8] sm:$0xff]  ;;  %s352_s1 = smov [#allocation2]  }
   0x6   :  { %34 = vperm.xlu1 %311, %v23_v5   ;;  %31 = vperm.xlu0 %310, %v22_v6   ;;  %s257_s9 = sshll.u32 %s352_s1, 4  ;;  %s258_s9 = int_to_ptr.vmem [resolvable:$true] %s257_s9 }
   0x7   :  { %290 = vmatpush3.msra.mxu0 %v49_v4  ;;  %303 = vmatpush3.msra.mxu1 %v49_v4  ;;  %s328_s10 = scalar_lea.vmem %s258_s9, 512  ;;  %p333_p1 = scmp.lt.s32.totalorder %s258_s9, %s258_s9 }
   0x8   :  { %291 = vmatprep.subr.mxu0 %v48_v7  ;;  %301 = vmatprep.subr.mxu1 %v48_v7  ;;  %p329_p0 = scmp.ne.s32.totalorder %s258_s9, %s328_s10  ;;  %p334_p2 = scmp.lt.s32.totalorder %s328_s10, %s328_s10 }
   0x9   :  { %292 = vmatpush3.msra.mxu0 %v48_v7  ;;  %304 = vmatpush3.msra.mxu1 %v48_v7 }
   0xa   :  { %p335_p3 = por %p334_p2, %p333_p1 }
   0xc   :  { %p336_p4 = pnand %p335_p3, %p329_p0 }
  0x7d   :  { %v29_v10 = vpop.permute.xlu1 %28  ;;  %v26_v11 = vpop.permute.xlu0 %25 }
  0x7e   :  { %vm37_vm1 = vcmp.eq.s32.totalorder %v401_v9, %v29_v10  ;;  %vm36_vm2 = vcmp.eq.s32.totalorder %v401_v9, %v26_v11 }
  0x7f   :  { %v273_v13 = vsel %vm37_vm1, 1.0, %v351_v12  ;;  %v272_v14 = vsel %vm36_vm2, 1.0, %v351_v12 }
  0x80   :  { %293 = vmatprep.mubr.msk.f32.mxu0 %vm51_vm0, %v272_v14 }
  0x81   :  { %v35_v15 = vpop.permute.xlu1 %34  ;;  %v32_v16 = vpop.permute.xlu0 %31  ;;  %294 = vmatmul.mubr.msk.f32.vlgmr.msra.gmra.mxu0 %vm51_vm0, %v273_v13 }
  0x82   :  { %vm39_vm3 = vcmp.eq.s32.totalorder %v401_v9, %v35_v15  ;;  %vm38_vm4 = vcmp.eq.s32.totalorder %v401_v9, %v32_v16 }
  0x83   :  { %v275_v17 = vsel %vm39_vm3, 1.0, %v351_v12  ;;  %v274_v18 = vsel %vm38_vm4, 1.0, %v351_v12 }
  0x84   :  { %296 = vmatprep.mubr.msk.f32.mxu1 %vm51_vm0, %v274_v18 }
  0x85   :  { %297 = vmatmul.mubr.msk.f32.vlgmr.msra.gmra.mxu1 %vm51_vm0, %v275_v17 }
 0x141   :  { %v295_v19 = vpop.f32.mrf.mxu0 }
 0x142   :  { %150 = vst [vmem:[#allocation2 + $0x8] sm:$0xff] %v295_v19  ;;  %159 = vmax.xlane.f32.xlu1 %v295_v19 }
 0x143   :  { %v130_v20 = vpop.f32.mrf.mxu0 }
 0x144   :  { %149 = vst [vmem:[#allocation2] sm:$0xff] %v130_v20  ;;  %157 = vmax.xlane.f32.xlu0 %v130_v20 }
 0x145   :  { %v298_v21 = vpop.f32.mrf.mxu1 }
 0x146   :  { %152 = vst [vmem:[#allocation2 + $0x18] sm:$0xff] %v298_v21 }
 0x147   :  { %v140_v22 = vpop.f32.mrf.mxu1 }
 0x148   :  { %151 = vst [vmem:[#allocation2 + $0x10] sm:$0xff] %v140_v22  ;;  %161 = vmax.xlane.f32.xlu0 %v140_v22 }
 0x14c   :  { %163 = vmax.xlane.f32.xlu0 %v298_v21 }
 0x153   :  { %198 = vperm.xlu1 %311, %v153_v23  }
 0x157   :  { %204 = vperm.xlu1 %311, %v155_v24  }
 0x15b   :  { %207 = vperm.xlu1 %311, %v156_v25  }
 0x162   :  { %201 = vperm.xlu0 %310, %v154_v26  }
 0x1cb   :  { %v419_v27 = vpop.xlane.xlu1 %159 }
 0x1cc   :  { %v166_v28 = vsub.f32 %v295_v19, %v419_v27 }
 0x1cd   :  { %v422_v29 = vpop.xlane.xlu0 %157 }
 0x1ce   :  { %v171_v30 = vmul.f32 1.442695, %v166_v28  ;;  %v165_v31 = vsub.f32 %v130_v20, %v422_v29 }
 0x1cf   :  { %v199_v39 = vpop.permute.xlu1 %198 }
 0x1d0   :  { %312 = vpow2.f32 %v171_v30  ;;  %v169_v32 = vmul.f32 1.442695, %v165_v31  ;;  %vm209_vm5 = vcmp.eq.s32.totalorder %v401_v9, %v199_v39 }
 0x1d1   :  { %v425_v33 = vpop.xlane.xlu0 %161  ;;  %v213_v43 = vsel %vm209_vm5, %v130_v20, 0.0 }
 0x1d2   :  { %314 = vpow2.f32 %v169_v32  ;;  %v167_v34 = vsub.f32 %v140_v22, %v425_v33 }
 0x1d3   :  { %v205_v42 = vpop.permute.xlu1 %204 }
 0x1d4   :  { %v173_v35 = vmul.f32 1.442695, %v167_v34  ;;  %vm211_vm6 = vcmp.eq.s32.totalorder %v401_v9, %v205_v42 }
 0x1d5   :  { %v428_v36 = vpop.xlane.xlu0 %163  ;;  %v215_v46 = vsel %vm211_vm6, %v140_v22, 0.0 }
 0x1d6   :  { %316 = vpow2.f32 %v173_v35  ;;  %v168_v37 = vsub.f32 %v298_v21, %v428_v36 }
 0x1d7   :  { %v208_v48 = vpop.permute.xlu1 %207 }
 0x1d8   :  { %v175_v38 = vmul.f32 1.442695, %v168_v37  ;;  %vm212_vm8 = vcmp.eq.s32.totalorder %v401_v9, %v208_v48 }
 0x1d9   :  { %v216_v50 = vsel %vm212_vm8, %v298_v21, 0.0 }
 0x1da   :  { %318 = vpow2.f32 %v175_v38 }
 0x1dd   :  { %v313_v40 = vpop.eup %312  ;;  %v202_v45 = vpop.permute.xlu0 %201 }
 0x1de   :  { %179 = vadd.xlane.f32.xlu1 %v313_v40  ;;  %vm210_vm7 = vcmp.eq.s32.totalorder %v401_v9, %v202_v45 }
 0x1df   :  { %v315_v41 = vpop.eup %314  ;;  %v214_v49 = vsel %vm210_vm7, %v295_v19, 0.0 }
 0x1e0   :  { %177 = vadd.xlane.f32.xlu0 %v315_v41 }
 0x1e2   :  { %217 = vadd.xlane.f32.xlu1 %v213_v43 }
 0x1e3   :  { %v317_v44 = vpop.eup %316 }
 0x1e4   :  { %181 = vadd.xlane.f32.xlu0 %v317_v44 }
 0x1e6   :  { %221 = vadd.xlane.f32.xlu1 %v215_v46 }
 0x1e7   :  { %v319_v47 = vpop.eup %318 }
 0x1e8   :  { %183 = vadd.xlane.f32.xlu0 %v319_v47 }
 0x1ec   :  { %219 = vadd.xlane.f32.xlu0 %v214_v49 }
 0x1f0   :  { %223 = vadd.xlane.f32.xlu0 %v216_v50 }
 0x1f1   :  { %339 = shalt.err (!%p336_p4)
}
 0x1f2   :  { %s353_s11 = smov 128   ;;  %s354_s12 = smov 8   ;;  %vm247_vm9 = vcmask 7168  }
 0x1f3   :  { %263 = dma.vmem_to_hbm [thread:$0]  %s258_s9, 512, %s461_s3, [#allocation3], %s353_s11, %s353_s11, %s354_s12  }
 0x267   :  { %v180_v51 = vpop.xlane.xlu1 %179 }
 0x268   :  { %320 = vlog2.f32 %v180_v51 }
 0x269   :  { %v178_v52 = vpop.xlane.xlu0 %177 }
 0x26a   :  { %322 = vlog2.f32 %v178_v52 }
 0x26b   :  { %v218_v60 = vpop.xlane.xlu1 %217 }
 0x26d   :  { %v182_v53 = vpop.xlane.xlu0 %181 }
 0x26e   :  { %324 = vlog2.f32 %v182_v53 }
 0x26f   :  { %v222_v5 = vpop.xlane.xlu1 %221 }
 0x271   :  { %v184_v54 = vpop.xlane.xlu0 %183 }
 0x272   :  { %326 = vlog2.f32 %v184_v54 }
 0x275   :  { %v321_v55 = vpop.eup %320  ;;  %v220_v61 = vpop.xlane.xlu0 %219 }
 0x276   :  { %v188_v56 = vmul.f32 0.6931472, %v321_v55 }
 0x277   :  { %v323_v57 = vpop.eup %322 }
 0x278   :  { %v186_v58 = vmul.f32 0.6931472, %v323_v57  ;;  %v194_v59 = vadd.f32 %v188_v56, %v419_v27 }
 0x279   :  { %v224_v9 = vpop.xlane.xlu0 %223 }
 0x27a   :  { %v193_v62 = vadd.f32 %v186_v58, %v422_v29  ;;  %v240_v63 = vsub.f32 %v194_v59, %v220_v61 }
 0x27b   :  { %v325_v0 = vpop.eup %324 }
 0x27c   :  { %v239_v1 = vsub.f32 %v193_v62, %v218_v60  ;;  %v190_v2 = vmul.f32 0.6931472, %v325_v0  ;;  %249 = vst.msk [vmem:[%s462_s4 + $0x8] sm:$0xff] %vm247_vm9, %v240_v63 }
 0x27e   :  { %248 = vst.msk [vmem:[%s462_s4] sm:$0xff] %vm247_vm9, %v239_v1  ;;  %v195_v3 = vadd.f32 %v190_v2, %v425_v33 }
 0x27f   :  { %v327_v4 = vpop.eup %326 }
 0x280   :  { %v241_v6 = vsub.f32 %v195_v3, %v222_v5  ;;  %v192_v7 = vmul.f32 0.6931472, %v327_v4 }
 0x282   :  { %250 = vst.msk [vmem:[%s462_s4 + $0x10] sm:$0xff] %vm247_vm9, %v241_v6  ;;  %v196_v8 = vadd.f32 %v192_v7, %v428_v36 }
 0x284   :  { %v242_v10 = vsub.f32 %v196_v8, %v224_v9 }
 0x286   :  { %251 = vst.msk [vmem:[%s462_s4 + $0x18] sm:$0xff] %vm247_vm9, %v242_v10 }
 0x287   :  { %348 = dma.done.wait [#allocation3], 512  }
 0x288   :  { %349 = vsyncadd [#allocation3], 4294966784 }
 0x289   :  { %271 = vsyncpa [#allocation3], 1 }

</bundles_post_ra>
